<compile_context>
chip_gen: v7x
topology: tpu7x:2x2x1
jax: 0.10.0
libtpu: 0.0.40
codegen_flags: <defaults>
</compile_context>

<pallas_src>
import jax
import jax.numpy as jnp
import numpy as np
from jax.experimental import pallas as pl
from jax.experimental.pallas import tpu as pltpu

HIDDEN_DIM = 32          # cfg.MODEL.MLP.HIDDEN_DIM
IN_DIM = 28 * 28         # 784
OUT_DIM = 10
LN_EPS = 1e-5
DEFAULT_TILE_B = 4096    # f32 x-tile ~12.3 MiB (x2 double-buffered) -> fits w/ vmem bump
VMEM_LIMIT_BYTES = 40 * 1024 * 1024


def _layernorm(h, gamma, beta):
    mu = jnp.mean(h, axis=-1, keepdims=True)
    var = jnp.mean(h * h, axis=-1, keepdims=True) - mu * mu   # E[h^2] - mu^2
    return (h - mu) * jax.lax.rsqrt(var + LN_EPS) * gamma + beta


def mlp_kernel(x_ref,
               w1_ref, b1_ref, g1_ref, be1_ref,
               w2_ref, b2_ref, g2_ref, be2_ref,
               w3_ref, b3_ref,
               out_ref):
    # Linear(784 -> H) + LayerNorm(H) + Sigmoid.  x/w1 may be f32 or bf16;
    # the MXU accumulates in f32 via preferred_element_type.
    h = jnp.dot(x_ref[...], w1_ref[...],
                preferred_element_type=jnp.float32) + b1_ref[...]
    h = jax.nn.sigmoid(_layernorm(h, g1_ref[...], be1_ref[...]))

    # Linear(H -> H//2) + LayerNorm(H//2) + Sigmoid
    h = jnp.dot(h, w2_ref[...], preferred_element_type=jnp.float32) + b2_ref[...]
    h = jax.nn.sigmoid(_layernorm(h, g2_ref[...], be2_ref[...]))

    # Linear(H//2 -> 10); narrow (masked) store, block last dim == full array dim.
    logits = jnp.dot(h, w3_ref[...], preferred_element_type=jnp.float32) + b3_ref[...]
    out_ref[...] = logits.astype(out_ref.dtype)


def _round_up(n, m):
    return ((n + m - 1) // m) * m


def mlp_forward(x_nchw, params, *, tile_b=DEFAULT_TILE_B):
    B = x_nchw.shape[0]
    x = x_nchw.reshape(B, -1)            # == torch x.view(B, -1); no dtype cast

    # Pad batch only up to the 8-row sublane granule (cheap / fusible).
    b_pad = _round_up(max(B, 1), 8)
    if b_pad != B:
        x = jnp.pad(x, ((0, b_pad - B), (0, 0)))

    # Tile: multiple of 8, capped at tile_b, and chosen so the grid has >=2
    # steps when possible (lets the "parallel" axis shard across v7x's 2 TCs).
    tile = min(_round_up(max(tile_b, 8), 8),
               max(8, _round_up(pl.cdiv(b_pad, 2), 8)))
    num_tiles = pl.cdiv(b_pad, tile)     # last block may be partial -> masked

    (w1, b1, g1, be1, w2, b2, g2, be2, w3, b3) = params
    w1 = w1.astype(x.dtype)              # keep first matmul single-dtype (tiny array)
    inputs = (x, w1, b1, g1, be1, w2, b2, g2, be2, w3, b3)

    # Weights/biases map to the same block every step -> VMEM-resident, no re-DMA.
    resident = lambda a: pl.BlockSpec(a.shape, lambda i: (0,) * a.ndim)

    H = HIDDEN_DIM
    flops = 2 * b_pad * (IN_DIM * H + H * (H // 2) + (H // 2) * OUT_DIM)
    bytes_accessed = (
        x.size * x.dtype.itemsize
        + b_pad * OUT_DIM * 4
        + sum(int(np.prod(a.shape)) * a.dtype.itemsize for a in inputs[1:]))

    out_padded = pl.pallas_call(
        mlp_kernel,
        out_shape=jax.ShapeDtypeStruct((b_pad, OUT_DIM), jnp.float32),
        grid_spec=pltpu.PrefetchScalarGridSpec(
            num_scalar_prefetch=0,
            grid=(num_tiles,),
            in_specs=[pl.BlockSpec((tile, IN_DIM), lambda i: (i, 0))]
                     + [resident(a) for a in inputs[1:]],
            out_specs=pl.BlockSpec((tile, OUT_DIM), lambda i: (i, 0)),
        ),
        compiler_params=pltpu.CompilerParams(
            dimension_semantics=("parallel",),
            vmem_limit_bytes=VMEM_LIMIT_BYTES,
            # Let XLA fuse the reshape/pad producer of x into the kernel operand
            # instead of materializing another copy of x in HBM.
            allow_input_fusion=[True] + [False] * (len(inputs) - 1)),
        cost_estimate=pl.CostEstimate(
            flops=flops,
            transcendentals=2 * b_pad * (H + H // 2),
            bytes_accessed=bytes_accessed),
    )(*inputs)

    return out_padded[:B]


def init_params(key):
    """Deterministic init mimicking PyTorch Linear default (U[-1/sqrt(fan_in), +])."""
    def linear(key, fan_in, fan_out):
        kw, kb = jax.random.split(key)
        bound = 1.0 / np.sqrt(fan_in)
        w = jax.random.uniform(kw, (fan_in, fan_out), jnp.float32, -bound, bound)
        b = jax.random.uniform(kb, (1, fan_out), jnp.float32, -bound, bound)
        return w, b

    k1, k2, k3 = jax.random.split(key, 3)
    H = HIDDEN_DIM
    w1, b1 = linear(k1, IN_DIM, H)
    g1, be1 = jnp.ones((1, H), jnp.float32), jnp.zeros((1, H), jnp.float32)
    w2, b2 = linear(k2, H, H // 2)
    g2, be2 = jnp.ones((1, H // 2), jnp.float32), jnp.zeros((1, H // 2), jnp.float32)
    w3, b3 = linear(k3, H // 2, OUT_DIM)
    return (w1, b1, g1, be1, w2, b2, g2, be2, w3, b3)


def mlp_reference(x_nchw, params):
    (w1, b1, g1, be1, w2, b2, g2, be2, w3, b3) = params
    x = x_nchw.reshape(x_nchw.shape[0], -1).astype(jnp.float32)
    h = x @ w1 + b1
    h = jax.nn.sigmoid(_layernorm(h, g1, be1))
    h = h @ w2 + b2
    h = jax.nn.sigmoid(_layernorm(h, g2, be2))
    return h @ w3 + b3


if __name__ == "__main__":
    key = jax.random.PRNGKey(0)
    kx, kp = jax.random.split(key)

    B = 2
    x = jax.random.normal(kx, (B, 1, 28, 28), jnp.float32)  # NCHW, MNIST-like
    params = init_params(kp)
    ref = mlp_reference(x, params)

    # f32 streaming (default: no cast anywhere): tight check vs f32 reference.
    out_f32 = jax.block_until_ready(mlp_forward(x, params))
    np.testing.assert_allclose(np.asarray(out_f32), np.asarray(ref),
                               rtol=1e-5, atol=1e-5)

    # bf16 streaming path: caller hands bf16 x directly (no extra HBM copy in
    # the wrapper); looser tolerance.
    out_bf16 = jax.block_until_ready(
        mlp_forward(x.astype(jnp.bfloat16), params))
    np.testing.assert_allclose(np.asarray(out_bf16), np.asarray(ref),
                               rtol=2e-2, atol=2e-2)

    # Multi-step grid + ragged batch (B not a multiple of 8, not a tile
    # multiple): exercises pad-to-8, cdiv grid, and edge-block masking.
    B2 = 20
    x2 = jax.random.normal(kx, (B2, 1, 28, 28), jnp.float32)
    ref2 = mlp_reference(x2, params)
    out2 = jax.block_until_ready(mlp_forward(x2, params, tile_b=8))
    np.testing.assert_allclose(np.asarray(out2), np.asarray(ref2),
                               rtol=1e-5, atol=1e-5)

    # Partial last block (tile=16 over b_pad=24): OOB rows read garbage but are
    # row-local and masked on store, then sliced off here.
    out3 = jax.block_until_ready(mlp_forward(x2, params, tile_b=16))
    np.testing.assert_allclose(np.asarray(out3), np.asarray(ref2),
                               rtol=1e-5, atol=1e-5)

    print("KERNEL_OK")
</pallas_src>

<mosaic_0001>
module attributes {stable_mosaic.version = 11 : i64} {
  func.func @mlp_kernel(%arg0: i32, %arg1: memref<8x784xf32, #tpu.memory_space<vmem>>, %arg2: memref<784x32xf32, #tpu.memory_space<vmem>>, %arg3: memref<1x32xf32, #tpu.memory_space<vmem>>, %arg4: memref<1x32xf32, #tpu.memory_space<vmem>>, %arg5: memref<1x32xf32, #tpu.memory_space<vmem>>, %arg6: memref<32x16xf32, #tpu.memory_space<vmem>>, %arg7: memref<1x16xf32, #tpu.memory_space<vmem>>, %arg8: memref<1x16xf32, #tpu.memory_space<vmem>>, %arg9: memref<1x16xf32, #tpu.memory_space<vmem>>, %arg10: memref<16x10xf32, #tpu.memory_space<vmem>>, %arg11: memref<1x10xf32, #tpu.memory_space<vmem>>, %arg12: memref<8x10xf32, #tpu.memory_space<vmem>>) attributes {dimension_semantics = [#tpu.dimension_semantics<parallel>], iteration_bounds = array<i64: 1>, scalar_prefetch = 0 : i64, scratch_operands = 0 : i64, tpu.core_type = #tpu.core_type<tc>, window_params = [{transform_indices = @transform_0, window_bounds = array<i64: 8, 784>}, {pipeline_mode = #tpu.pipeline_mode<synchronous>, transform_indices = @transform_1, window_bounds = array<i64: 784, 32>}, {pipeline_mode = #tpu.pipeline_mode<synchronous>, transform_indices = @transform_2, window_bounds = array<i64: 1, 32>}, {pipeline_mode = #tpu.pipeline_mode<synchronous>, transform_indices = @transform_3, window_bounds = array<i64: 1, 32>}, {pipeline_mode = #tpu.pipeline_mode<synchronous>, transform_indices = @transform_4, window_bounds = array<i64: 1, 32>}, {pipeline_mode = #tpu.pipeline_mode<synchronous>, transform_indices = @transform_5, window_bounds = array<i64: 32, 16>}, {pipeline_mode = #tpu.pipeline_mode<synchronous>, transform_indices = @transform_6, window_bounds = array<i64: 1, 16>}, {pipeline_mode = #tpu.pipeline_mode<synchronous>, transform_indices = @transform_7, window_bounds = array<i64: 1, 16>}, {pipeline_mode = #tpu.pipeline_mode<synchronous>, transform_indices = @transform_8, window_bounds = array<i64: 1, 16>}, {pipeline_mode = #tpu.pipeline_mode<synchronous>, transform_indices = @transform_9, window_bounds = array<i64: 16, 10>}, {pipeline_mode = #tpu.pipeline_mode<synchronous>, transform_indices = @transform_10, window_bounds = array<i64: 1, 10>}, {transform_indices = @transform_11, window_bounds = array<i64: 8, 10>}]} {
    %c0 = arith.constant 0 : index
    %c0_0 = arith.constant 0 : index
    %0 = vector.load %arg1[%c0, %c0_0] : memref<8x784xf32, #tpu.memory_space<vmem>>, vector<8x784xf32>
    %c0_1 = arith.constant 0 : index
    %c0_2 = arith.constant 0 : index
    %1 = vector.load %arg2[%c0_1, %c0_2] : memref<784x32xf32, #tpu.memory_space<vmem>>, vector<784x32xf32>
    %cst = arith.constant dense<0.000000e+00> : vector<8x32xf32>
    %2 = tpu.matmul %0, %1, %cst {dimension_numbers = #tpu.dot_dimension_numbers<[1], [0], [0], [1], [0, 0, 1, 1], [], []>} : vector<8x784xf32>, vector<784x32xf32>, vector<8x32xf32> -> vector<8x32xf32>
    %c0_3 = arith.constant 0 : index
    %c0_4 = arith.constant 0 : index
    %3 = vector.load %arg3[%c0_3, %c0_4] : memref<1x32xf32, #tpu.memory_space<vmem>>, vector<1x32xf32>
    %4 = vector.broadcast %3 : vector<1x32xf32> to vector<8x32xf32>
    %5 = arith.addf %2, %4 : vector<8x32xf32>
    %c0_5 = arith.constant 0 : index
    %c0_6 = arith.constant 0 : index
    %6 = vector.load %arg4[%c0_5, %c0_6] : memref<1x32xf32, #tpu.memory_space<vmem>>, vector<1x32xf32>
    %c0_7 = arith.constant 0 : index
    %c0_8 = arith.constant 0 : index
    %7 = vector.load %arg5[%c0_7, %c0_8] : memref<1x32xf32, #tpu.memory_space<vmem>>, vector<1x32xf32>
    %cst_9 = arith.constant dense<0.000000e+00> : vector<8xf32>
    %8 = vector.multi_reduction <add>, %5, %cst_9 [1] : vector<8x32xf32> to vector<8xf32>
    %9 = vector.shape_cast %8 : vector<8xf32> to vector<8x1xf32>
    %cst_10 = arith.constant 3.200000e+01 : f32
    %10 = vector.broadcast %cst_10 : f32 to vector<8x1xf32>
    %11 = arith.divf %9, %10 : vector<8x1xf32>
    %12 = arith.mulf %5, %5 : vector<8x32xf32>
    %cst_11 = arith.constant dense<0.000000e+00> : vector<8xf32>
    %13 = vector.multi_reduction <add>, %12, %cst_11 [1] : vector<8x32xf32> to vector<8xf32>
    %14 = vector.shape_cast %13 : vector<8xf32> to vector<8x1xf32>
    %cst_12 = arith.constant 3.200000e+01 : f32
    %15 = vector.broadcast %cst_12 : f32 to vector<8x1xf32>
    %16 = arith.divf %14, %15 : vector<8x1xf32>
    %17 = arith.mulf %11, %11 : vector<8x1xf32>
    %18 = arith.subf %16, %17 : vector<8x1xf32>
    %19 = vector.broadcast %11 : vector<8x1xf32> to vector<8x32xf32>
    %20 = arith.subf %5, %19 : vector<8x32xf32>
    %cst_13 = arith.constant 9.99999974E-6 : f32
    %21 = vector.broadcast %cst_13 : f32 to vector<8x1xf32>
    %22 = arith.addf %18, %21 : vector<8x1xf32>
    %23 = math.rsqrt %22 : vector<8x1xf32>
    %24 = vector.broadcast %23 : vector<8x1xf32> to vector<8x32xf32>
    %25 = arith.mulf %20, %24 : vector<8x32xf32>
    %26 = vector.broadcast %6 : vector<1x32xf32> to vector<8x32xf32>
    %27 = arith.mulf %25, %26 : vector<8x32xf32>
    %28 = vector.broadcast %7 : vector<1x32xf32> to vector<8x32xf32>
    %29 = arith.addf %27, %28 : vector<8x32xf32>
    %30 = arith.negf %29 : vector<8x32xf32>
    %31 = math.exp %30 : vector<8x32xf32>
    %cst_14 = arith.constant 1.000000e+00 : f32
    %32 = vector.broadcast %cst_14 : f32 to vector<8x32xf32>
    %33 = arith.addf %32, %31 : vector<8x32xf32>
    %34 = arith.divf %32, %33 : vector<8x32xf32>
    %c0_15 = arith.constant 0 : index
    %c0_16 = arith.constant 0 : index
    %35 = vector.load %arg6[%c0_15, %c0_16] : memref<32x16xf32, #tpu.memory_space<vmem>>, vector<32x16xf32>
    %cst_17 = arith.constant dense<0.000000e+00> : vector<8x16xf32>
    %36 = tpu.matmul %34, %35, %cst_17 {dimension_numbers = #tpu.dot_dimension_numbers<[1], [0], [0], [1], [0, 0, 1, 1], [], []>} : vector<8x32xf32>, vector<32x16xf32>, vector<8x16xf32> -> vector<8x16xf32>
    %c0_18 = arith.constant 0 : index
    %c0_19 = arith.constant 0 : index
    %37 = vector.load %arg7[%c0_18, %c0_19] : memref<1x16xf32, #tpu.memory_space<vmem>>, vector<1x16xf32>
    %38 = vector.broadcast %37 : vector<1x16xf32> to vector<8x16xf32>
    %39 = arith.addf %36, %38 : vector<8x16xf32>
    %c0_20 = arith.constant 0 : index
    %c0_21 = arith.constant 0 : index
    %40 = vector.load %arg8[%c0_20, %c0_21] : memref<1x16xf32, #tpu.memory_space<vmem>>, vector<1x16xf32>
    %c0_22 = arith.constant 0 : index
    %c0_23 = arith.constant 0 : index
    %41 = vector.load %arg9[%c0_22, %c0_23] : memref<1x16xf32, #tpu.memory_space<vmem>>, vector<1x16xf32>
    %cst_24 = arith.constant dense<0.000000e+00> : vector<8xf32>
    %42 = vector.multi_reduction <add>, %39, %cst_24 [1] : vector<8x16xf32> to vector<8xf32>
    %43 = vector.shape_cast %42 : vector<8xf32> to vector<8x1xf32>
    %cst_25 = arith.constant 1.600000e+01 : f32
    %44 = vector.broadcast %cst_25 : f32 to vector<8x1xf32>
    %45 = arith.divf %43, %44 : vector<8x1xf32>
    %46 = arith.mulf %39, %39 : vector<8x16xf32>
    %cst_26 = arith.constant dense<0.000000e+00> : vector<8xf32>
    %47 = vector.multi_reduction <add>, %46, %cst_26 [1] : vector<8x16xf32> to vector<8xf32>
    %48 = vector.shape_cast %47 : vector<8xf32> to vector<8x1xf32>
    %cst_27 = arith.constant 1.600000e+01 : f32
    %49 = vector.broadcast %cst_27 : f32 to vector<8x1xf32>
    %50 = arith.divf %48, %49 : vector<8x1xf32>
    %51 = arith.mulf %45, %45 : vector<8x1xf32>
    %52 = arith.subf %50, %51 : vector<8x1xf32>
    %53 = vector.broadcast %45 : vector<8x1xf32> to vector<8x16xf32>
    %54 = arith.subf %39, %53 : vector<8x16xf32>
    %cst_28 = arith.constant 9.99999974E-6 : f32
    %55 = vector.broadcast %cst_28 : f32 to vector<8x1xf32>
    %56 = arith.addf %52, %55 : vector<8x1xf32>
    %57 = math.rsqrt %56 : vector<8x1xf32>
    %58 = vector.broadcast %57 : vector<8x1xf32> to vector<8x16xf32>
    %59 = arith.mulf %54, %58 : vector<8x16xf32>
    %60 = vector.broadcast %40 : vector<1x16xf32> to vector<8x16xf32>
    %61 = arith.mulf %59, %60 : vector<8x16xf32>
    %62 = vector.broadcast %41 : vector<1x16xf32> to vector<8x16xf32>
    %63 = arith.addf %61, %62 : vector<8x16xf32>
    %64 = arith.negf %63 : vector<8x16xf32>
    %65 = math.exp %64 : vector<8x16xf32>
    %cst_29 = arith.constant 1.000000e+00 : f32
    %66 = vector.broadcast %cst_29 : f32 to vector<8x16xf32>
    %67 = arith.addf %66, %65 : vector<8x16xf32>
    %68 = arith.divf %66, %67 : vector<8x16xf32>
    %c0_30 = arith.constant 0 : index
    %c0_31 = arith.constant 0 : index
    %69 = vector.load %arg10[%c0_30, %c0_31] : memref<16x10xf32, #tpu.memory_space<vmem>>, vector<16x10xf32>
    %cst_32 = arith.constant dense<0.000000e+00> : vector<8x10xf32>
    %70 = tpu.matmul %68, %69, %cst_32 {dimension_numbers = #tpu.dot_dimension_numbers<[1], [0], [0], [1], [0, 0, 1, 1], [], []>} : vector<8x16xf32>, vector<16x10xf32>, vector<8x10xf32> -> vector<8x10xf32>
    %c0_33 = arith.constant 0 : index
    %c0_34 = arith.constant 0 : index
    %71 = vector.load %arg11[%c0_33, %c0_34] : memref<1x10xf32, #tpu.memory_space<vmem>>, vector<1x10xf32>
    %72 = vector.broadcast %71 : vector<1x10xf32> to vector<8x10xf32>
    %73 = arith.addf %70, %72 : vector<8x10xf32>
    %c0_35 = arith.constant 0 : index
    %c0_36 = arith.constant 0 : index
    %74 = vector.load %arg12[%c0_35, %c0_36] : memref<8x10xf32, #tpu.memory_space<vmem>>, vector<8x10xf32>
    tpu.vector_store %arg12[%c0_35, %c0_36], %73 {strides = array<i32>} : memref<8x10xf32, #tpu.memory_space<vmem>>, vector<8x10xf32>,
    return
  }
  func.func @transform_0(%arg0: i32) -> (i32, i32) {
    %c0_i32 = arith.constant 0 : i32
    %c0_i32_0 = arith.constant 0 : i32
    return %arg0, %c0_i32 : i32, i32
  }
  func.func @transform_1(%arg0: i32) -> (i32, i32) {
    %c0_i32 = arith.constant 0 : i32
    %c0_i32_0 = arith.constant 0 : i32
    %c0_i32_1 = arith.constant 0 : i32
    return %c0_i32, %c0_i32_0 : i32, i32
  }
  func.func @transform_2(%arg0: i32) -> (i32, i32) {
    %c0_i32 = arith.constant 0 : i32
    %c0_i32_0 = arith.constant 0 : i32
    %c0_i32_1 = arith.constant 0 : i32
    return %c0_i32, %c0_i32_0 : i32, i32
  }
  func.func @transform_3(%arg0: i32) -> (i32, i32) {
    %c0_i32 = arith.constant 0 : i32
    %c0_i32_0 = arith.constant 0 : i32
    %c0_i32_1 = arith.constant 0 : i32
    return %c0_i32, %c0_i32_0 : i32, i32
  }
  func.func @transform_4(%arg0: i32) -> (i32, i32) {
    %c0_i32 = arith.constant 0 : i32
    %c0_i32_0 = arith.constant 0 : i32
    %c0_i32_1 = arith.constant 0 : i32
    return %c0_i32, %c0_i32_0 : i32, i32
  }
  func.func @transform_5(%arg0: i32) -> (i32, i32) {
    %c0_i32 = arith.constant 0 : i32
    %c0_i32_0 = arith.constant 0 : i32
    %c0_i32_1 = arith.constant 0 : i32
    return %c0_i32, %c0_i32_0 : i32, i32
  }
  func.func @transform_6(%arg0: i32) -> (i32, i32) {
    %c0_i32 = arith.constant 0 : i32
    %c0_i32_0 = arith.constant 0 : i32
    %c0_i32_1 = arith.constant 0 : i32
    return %c0_i32, %c0_i32_0 : i32, i32
  }
  func.func @transform_7(%arg0: i32) -> (i32, i32) {
    %c0_i32 = arith.constant 0 : i32
    %c0_i32_0 = arith.constant 0 : i32
    %c0_i32_1 = arith.constant 0 : i32
    return %c0_i32, %c0_i32_0 : i32, i32
  }
  func.func @transform_8(%arg0: i32) -> (i32, i32) {
    %c0_i32 = arith.constant 0 : i32
    %c0_i32_0 = arith.constant 0 : i32
    %c0_i32_1 = arith.constant 0 : i32
    return %c0_i32, %c0_i32_0 : i32, i32
  }
  func.func @transform_9(%arg0: i32) -> (i32, i32) {
    %c0_i32 = arith.constant 0 : i32
    %c0_i32_0 = arith.constant 0 : i32
    %c0_i32_1 = arith.constant 0 : i32
    return %c0_i32, %c0_i32_0 : i32, i32
  }
  func.func @transform_10(%arg0: i32) -> (i32, i32) {
    %c0_i32 = arith.constant 0 : i32
    %c0_i32_0 = arith.constant 0 : i32
    %c0_i32_1 = arith.constant 0 : i32
    return %c0_i32, %c0_i32_0 : i32, i32
  }
  func.func @transform_11(%arg0: i32) -> (i32, i32) {
    %c0_i32 = arith.constant 0 : i32
    %c0_i32_0 = arith.constant 0 : i32
    return %arg0, %c0_i32 : i32, i32
  }
}

</mosaic_0001>

<bundles_post_ra>
// kernel: tpu_custom_call.1
= control target key start
LH: loop header
LB: loop body
LE: loop exit
PB: predicated region body
PF: predicated region fallthrough
CT: control target
= control target key end

     0   :  { %s1442_s0 = inlined_call_operand.vmem [shape: f32[8,784], index: 0, kind: input, shape index: {}]   ;;  %s1443_s1 = inlined_call_operand.vmem [shape: f32[784,32], index: 1, kind: input, shape index: {}]   ;;  %s1444_s2 = inlined_call_operand.vmem [shape: f32[1,32], index: 2, kind: input, shape index: {}]   ;;  %s1445_s3 = inlined_call_operand.vmem [shape: f32[1,32], index: 3, kind: input, shape index: {}]   ;;  %s1446_s4 = inlined_call_operand.vmem [shape: f32[1,32], index: 4, kind: input, shape index: {}]   ;;  %s1447_s5 = inlined_call_operand.vmem [shape: f32[32,16], index: 5, kind: input, shape index: {}]   ;;  %s1448_s6 = inlined_call_operand.vmem [shape: f32[1,16], index: 6, kind: input, shape index: {}]   ;;  %s1449_s7 = inlined_call_operand.vmem [shape: f32[1,16], index: 7, kind: input, shape index: {}]   ;;  %s1450_s8 = inlined_call_operand.vmem [shape: f32[1,16], index: 8, kind: input, shape index: {}]   ;;  %s1451_s9 = inlined_call_operand.vmem [shape: f32[16,10], index: 9, kind: input, shape index: {}]   ;;  %s1452_s10 = inlined_call_operand.vmem [shape: f32[1,10], index: 10, kind: input, shape index: {}]   ;;  %s1453_s11 = inlined_call_operand.hbm [shape: f32[8,10], index: 11, kind: output, shape index: {}]  }
   0x1   :  { %v62_v0 = vld [vmem:[%s1443_s1 + $0x80] sm:$0xff]  ;;  %v63_v1 = vld [vmem:[%s1443_s1 + $0x88] sm:$0xff]  ;;  %v64_v11 = vld [vmem:[%s1443_s1 + $0x90] sm:$0xff] }
   0x2   :  { %v46_v2 = vld [vmem:[%s1443_s1] sm:$0xff]  ;;  %v847_v3 = vpack.c.bf16 %v63_v1, %v62_v0  ;;  %v47_v4 = vld [vmem:[%s1443_s1 + $0x8] sm:$0xff]  ;;  %v65_v13 = vld [vmem:[%s1443_s1 + $0x98] sm:$0xff] }
   0x3   :  { %v94_v5 = vld [vmem:[%s1443_s1 + $0x180] sm:$0xff]  ;;  %v95_v6 = vld [vmem:[%s1443_s1 + $0x188] sm:$0xff]  ;;  %v849_v7 = vpack.c.bf16 %v47_v4, %v46_v2  ;;  %v48_v14 = vld [vmem:[%s1443_s1 + $0x10] sm:$0xff]  ;;  %v851_v16 = vpack.c.bf16 %v65_v13, %v64_v11 }
   0x4   :  { %v879_v8 = vpack.c.bf16 %v95_v6, %v94_v5  ;;  %v78_v9 = vld [vmem:[%s1443_s1 + $0x100] sm:$0xff]  ;;  %v79_v10 = vld [vmem:[%s1443_s1 + $0x108] sm:$0xff]  ;;  %848 = vmatprep.subr.bf16.mxu0 %v847_v3  ;;  %v49_v15 = vld [vmem:[%s1443_s1 + $0x18] sm:$0xff] }
   0x5   :  { %v881_v12 = vpack.c.bf16 %v79_v10, %v78_v9  ;;  %850 = vmatpush3.bf16.msra.mxu0 %v849_v7  ;;  %v853_v17 = vpack.c.bf16 %v49_v15, %v48_v14  ;;  %v96_v18 = vld [vmem:[%s1443_s1 + $0x190] sm:$0xff]  ;;  %v97_v19 = vld [vmem:[%s1443_s1 + $0x198] sm:$0xff]  ;;  %v66_v23 = vld [vmem:[%s1443_s1 + $0xa0] sm:$0xff] }
   0x6   :  { %880 = vmatprep.subr.bf16.mxu1 %v879_v8  ;;  %v80_v20 = vld [vmem:[%s1443_s1 + $0x110] sm:$0xff]  ;;  %v883_v21 = vpack.c.bf16 %v97_v19, %v96_v18  ;;  %v81_v22 = vld [vmem:[%s1443_s1 + $0x118] sm:$0xff]  ;;  %v67_v24 = vld [vmem:[%s1443_s1 + $0xa8] sm:$0xff]  ;;  %852 = vmatprep.subr.bf16.mxu0 %v851_v16 }
   0x7   :  { %882 = vmatpush3.bf16.msra.mxu1 %v881_v12  ;;  %v885_v25 = vpack.c.bf16 %v81_v22, %v80_v20  ;;  %v855_v26 = vpack.c.bf16 %v67_v24, %v66_v23  ;;  %v50_v27 = vld [vmem:[%s1443_s1 + $0x20] sm:$0xff]  ;;  %v51_v28 = vld [vmem:[%s1443_s1 + $0x28] sm:$0xff]  ;;  %v68_v35 = vld [vmem:[%s1443_s1 + $0xb0] sm:$0xff] }
   0x8   :  { %v98_v29 = vld [vmem:[%s1443_s1 + $0x1a0] sm:$0xff]  ;;  %884 = vmatprep.subr.bf16.mxu1 %v883_v21  ;;  %v99_v30 = vld [vmem:[%s1443_s1 + $0x1a8] sm:$0xff]  ;;  %v857_v33 = vpack.c.bf16 %v51_v28, %v50_v27  ;;  %v69_v36 = vld [vmem:[%s1443_s1 + $0xb8] sm:$0xff] }
   0x9   :  { %v82_v31 = vld [vmem:[%s1443_s1 + $0x120] sm:$0xff]  ;;  %v83_v32 = vld [vmem:[%s1443_s1 + $0x128] sm:$0xff]  ;;  %854 = vmatpush3.bf16.msra.mxu0 %v853_v17  ;;  %v887_v34 = vpack.c.bf16 %v99_v30, %v98_v29  ;;  %v52_v37 = vld [vmem:[%s1443_s1 + $0x30] sm:$0xff]  ;;  %v859_v39 = vpack.c.bf16 %v69_v36, %v68_v35 }
   0xa   :  { %856 = vmatprep.subr.bf16.mxu0 %v855_v26  ;;  %v889_v38 = vpack.c.bf16 %v83_v32, %v82_v31  ;;  %v53_v40 = vld [vmem:[%s1443_s1 + $0x38] sm:$0xff]  ;;  %v100_v41 = vld [vmem:[%s1443_s1 + $0x1b0] sm:$0xff]  ;;  %v70_v46 = vld [vmem:[%s1443_s1 + $0xc0] sm:$0xff] }
   0xb   :  { %886 = vmatpush3.bf16.msra.mxu1 %v885_v25  ;;  %v101_v42 = vld [vmem:[%s1443_s1 + $0x1b8] sm:$0xff]  ;;  %v84_v44 = vld [vmem:[%s1443_s1 + $0x130] sm:$0xff]  ;;  %v71_v47 = vld [vmem:[%s1443_s1 + $0xc8] sm:$0xff]  ;;  %v861_v48 = vpack.c.bf16 %v53_v40, %v52_v37 }
   0xc   :  { %888 = vmatprep.subr.bf16.mxu1 %v887_v34  ;;  %v891_v43 = vpack.c.bf16 %v101_v42, %v100_v41  ;;  %v85_v45 = vld [vmem:[%s1443_s1 + $0x138] sm:$0xff]  ;;  %v102_v49 = vld [vmem:[%s1443_s1 + $0x1c0] sm:$0xff]  ;;  %v103_v50 = vld [vmem:[%s1443_s1 + $0x1c8] sm:$0xff]  ;;  %v863_v52 = vpack.c.bf16 %v71_v47, %v70_v46 }
   0xd   :  { %858 = vmatpush3.bf16.msra.mxu0 %v857_v33  ;;  %v893_v51 = vpack.c.bf16 %v85_v45, %v84_v44  ;;  %v54_v53 = vld [vmem:[%s1443_s1 + $0x40] sm:$0xff]  ;;  %v55_v54 = vld [vmem:[%s1443_s1 + $0x48] sm:$0xff]  ;;  %v895_v56 = vpack.c.bf16 %v103_v50, %v102_v49  ;;  %v72_v58 = vld [vmem:[%s1443_s1 + $0xd0] sm:$0xff]  ;;  %v995_v50 = vmov 0.0|0.0  }
   0xe   :  { %860 = vmatprep.subr.bf16.mxu0 %v859_v39  ;;  %v86_v55 = vld [vmem:[%s1443_s1 + $0x140] sm:$0xff]  ;;  %v87_v57 = vld [vmem:[%s1443_s1 + $0x148] sm:$0xff]  ;;  %v73_v59 = vld [vmem:[%s1443_s1 + $0xd8] sm:$0xff]  ;;  %v865_v62 = vpack.c.bf16 %v55_v54, %v54_v53 }
   0xf   :  { %890 = vmatpush3.bf16.msra.mxu1 %v889_v38  ;;  %v104_v60 = vld [vmem:[%s1443_s1 + $0x1d0] sm:$0xff]  ;;  %v105_v61 = vld [vmem:[%s1443_s1 + $0x1d8] sm:$0xff]  ;;  %v897_v63 = vpack.c.bf16 %v87_v57, %v86_v55  ;;  %v867_v0 = vpack.c.bf16 %v73_v59, %v72_v58  ;;  %v74_v6 = vld [vmem:[%s1443_s1 + $0xe0] sm:$0xff] }
  0x10   :  { %892 = vmatprep.subr.bf16.mxu1 %v891_v43  ;;  %v56_v1 = vld [vmem:[%s1443_s1 + $0x50] sm:$0xff]  ;;  %v57_v2 = vld [vmem:[%s1443_s1 + $0x58] sm:$0xff]  ;;  %v899_v4 = vpack.c.bf16 %v105_v61, %v104_v60  ;;  %v75_v7 = vld [vmem:[%s1443_s1 + $0xe8] sm:$0xff] }
  0x11   :  { %862 = vmatpush3.bf16.msra.mxu0 %v861_v48  ;;  %v88_v3 = vld [vmem:[%s1443_s1 + $0x150] sm:$0xff]  ;;  %v89_v5 = vld [vmem:[%s1443_s1 + $0x158] sm:$0xff]  ;;  %v106_v8 = vld [vmem:[%s1443_s1 + $0x1e0] sm:$0xff]  ;;  %v869_v10 = vpack.c.bf16 %v57_v2, %v56_v1  ;;  %v871_v14 = vpack.c.bf16 %v75_v7, %v74_v6 }
  0x12   :  { %864 = vmatprep.subr.bf16.mxu0 %v863_v52  ;;  %v107_v9 = vld [vmem:[%s1443_s1 + $0x1e8] sm:$0xff]  ;;  %v58_v11 = vld [vmem:[%s1443_s1 + $0x60] sm:$0xff]  ;;  %v901_v13 = vpack.c.bf16 %v89_v5, %v88_v3  ;;  %v76_v19 = vld [vmem:[%s1443_s1 + $0xf0] sm:$0xff] }
  0x13   :  { %894 = vmatpush3.bf16.msra.mxu1 %v893_v51  ;;  %v40_v12 = vld [vmem:[%s1442_s0 + $0x8] sm:$0xff]  ;;  %v90_v16 = vld [vmem:[%s1443_s1 + $0x160] sm:$0xff]  ;;  %v903_v18 = vpack.c.bf16 %v107_v9, %v106_v8  ;;  %v77_v20 = vld [vmem:[%s1443_s1 + $0xf8] sm:$0xff] }
  0x14   :  { %896 = vmatprep.subr.bf16.mxu1 %v895_v56  ;;  %v59_v15 = vld [vmem:[%s1443_s1 + $0x68] sm:$0xff]  ;;  %219 = vmatprep.mubr.f32.mxu0 %v40_v12  ;;  %v42_v21 = vld [vmem:[%s1442_s0 + $0x18] sm:$0xff]  ;;  %v108_v22 = vld [vmem:[%s1443_s1 + $0x1f0] sm:$0xff]  ;;  %v875_v26 = vpack.c.bf16 %v77_v20, %v76_v19 }
  0x15   :  { %866 = vmatpush3.bf16.msra.mxu0 %v865_v62  ;;  %v91_v17 = vld [vmem:[%s1443_s1 + $0x168] sm:$0xff]  ;;  %v109_v23 = vld [vmem:[%s1443_s1 + $0x1f8] sm:$0xff]  ;;  %289 = vmatprep.mubr.f32.mxu1 %v42_v21  ;;  %v873_v24 = vpack.c.bf16 %v59_v15, %v58_v11  ;;  %v60_v27 = vld [vmem:[%s1443_s1 + $0x70] sm:$0xff] }
  0x16   :  { %868 = vmatprep.subr.bf16.mxu0 %v867_v0  ;;  %v905_v25 = vpack.c.bf16 %v91_v17, %v90_v16  ;;  %v61_v28 = vld [vmem:[%s1443_s1 + $0x78] sm:$0xff]  ;;  %v92_v29 = vld [vmem:[%s1443_s1 + $0x170] sm:$0xff]  ;;  %v907_v30 = vpack.c.bf16 %v109_v23, %v108_v22  ;;  %v126_v32 = vld [vmem:[%s1443_s1 + $0x280] sm:$0xff] }
  0x17   :  { %898 = vmatpush3.bf16.msra.mxu1 %v897_v63  ;;  %v93_v31 = vld [vmem:[%s1443_s1 + $0x178] sm:$0xff]  ;;  %v127_v33 = vld [vmem:[%s1443_s1 + $0x288] sm:$0xff]  ;;  %v877_v34 = vpack.c.bf16 %v61_v28, %v60_v27  ;;  %v110_v37 = vld [vmem:[%s1443_s1 + $0x200] sm:$0xff] }
  0x18   :  { %900 = vmatprep.subr.bf16.mxu1 %v899_v4  ;;  %v909_v35 = vpack.c.bf16 %v93_v31, %v92_v29  ;;  %v911_v36 = vpack.c.bf16 %v127_v33, %v126_v32  ;;  %v111_v38 = vld [vmem:[%s1443_s1 + $0x208] sm:$0xff]  ;;  %v128_v39 = vld [vmem:[%s1443_s1 + $0x290] sm:$0xff]  ;;  %v129_v40 = vld [vmem:[%s1443_s1 + $0x298] sm:$0xff] }
  0x19   :  { %870 = vmatpush3.bf16.msra.mxu0 %v869_v10  ;;  %v39_v41 = vld [vmem:[%s1442_s0] sm:$0xff]  ;;  %v913_v42 = vpack.c.bf16 %v111_v38, %v110_v37  ;;  %v41_v43 = vld [vmem:[%s1442_s0 + $0x10] sm:$0xff]  ;;  %v915_v45 = vpack.c.bf16 %v129_v40, %v128_v39  ;;  %v113_v46 = vld [vmem:[%s1443_s1 + $0x218] sm:$0xff] }
  0x1a   :  { %872 = vmatprep.subr.bf16.mxu0 %v871_v14  ;;  %v112_v44 = vld [vmem:[%s1443_s1 + $0x210] sm:$0xff]  ;;  %v130_v47 = vld [vmem:[%s1443_s1 + $0x2a0] sm:$0xff]  ;;  %v131_v48 = vld [vmem:[%s1443_s1 + $0x2a8] sm:$0xff] }
  0x1b   :  { %902 = vmatpush3.bf16.msra.mxu1 %v901_v13  ;;  %v44_v49 = vld [vmem:[%s1442_s0 + $0x28] sm:$0xff]  ;;  %v142_v51 = vld [vmem:[%s1443_s1 + $0x300] sm:$0xff] }
  0x1c   :  { %904 = vmatprep.subr.bf16.mxu1 %v903_v18  ;;  %v143_v52 = vld [vmem:[%s1443_s1 + $0x308] sm:$0xff] }
  0x1d   :  { %874 = vmatpush3.bf16.msra.mxu0 %v873_v24  ;;  %v944_v53 = vpack.c.bf16 %v143_v52, %v142_v51 }
  0x1e   :  { %876 = vmatprep.subr.bf16.mxu0 %v875_v26 }
  0x1f   :  { %906 = vmatpush3.bf16.msra.mxu1 %v905_v25 }
  0x20   :  { %908 = vmatprep.subr.bf16.mxu1 %v907_v30 }
  0x21   :  { %878 = vmatpush3.bf16.msra.mxu0 %v877_v34 }
  0x22   :  { %912 = vmatprep.subr.bf16.mxu0 %v911_v36 }
  0x23   :  { %910 = vmatpush3.bf16.msra.mxu1 %v909_v35 }
  0x24   :  { %943 = vmatprep.subr.bf16.mxu1 %v995_v50  ;;  %220 = vmatmul.mubr.f32.vlgmr.msra.gmra.mrb[0].mxu0 %v39_v41 }
  0x25   :  { %16 = vsyncpa [#allocation3], 0  ;;  %914 = vmatpush3.bf16.msra.mxu0 %v913_v42  ;;  %v917_v54 = vpack.c.bf16 %v113_v46, %v112_v44  ;;  %v919_v55 = vpack.c.bf16 %v131_v48, %v130_v47  ;;  %v114_v56 = vld [vmem:[%s1443_s1 + $0x220] sm:$0xff]  ;;  %v115_v57 = vld [vmem:[%s1443_s1 + $0x228] sm:$0xff]  ;;  %359 = vmatprep.mubr.f32.mxu0 %v44_v49  ;;  %vm996_vm0 = vmmov 0   ;;  %v997_v60 = vmov 0.0  }
  0x26   :  { %290 = vmatmul.mubr.f32.vlgmr.msra.gmra.mrb[0].mxu1 %v41_v43  ;;  %916 = vmatprep.subr.bf16.mxu0 %v915_v45  ;;  %v132_v58 = vld [vmem:[%s1443_s1 + $0x2b0] sm:$0xff]  ;;  %v133_v59 = vld [vmem:[%s1443_s1 + $0x2b8] sm:$0xff]  ;;  %vm151_vm1 = vcmask 130048   ;;  %v921_v62 = vpack.c.bf16 %v115_v57, %v114_v56  ;;  %v134_v2 = vld [vmem:[%s1443_s1 + $0x2c0] sm:$0xff]  ;;  %vm437_vm2 = vcmask 261120   ;;  %vm678_vm3 = vcmask 80896  }
  0x27   :  { %945 = vmatpush3.bf16.msra.mxu1 %v944_v53  ;;  %826 = vmatprep.mubr.msk.f32.mxu1 %vm996_vm0, %v997_v60  ;;  %v45_v61 = vld [vmem:[%s1442_s0 + $0x30] sm:$0xff]  ;;  %v923_v63 = vpack.c.bf16 %v133_v59, %v132_v58  ;;  %v117_v1 = vld [vmem:[%s1443_s1 + $0x238] sm:$0xff]  ;;  %v135_v3 = vld [vmem:[%s1443_s1 + $0x2c8] sm:$0xff] }
  0x28   :  { %946 = vmatprep.subr.bf16.mxu1 %v995_v50  ;;  %v116_v0 = vld [vmem:[%s1443_s1 + $0x230] sm:$0xff]  ;;  %v927_v5 = vpack.c.bf16 %v135_v3, %v134_v2  ;;  %v118_v6 = vld [vmem:[%s1443_s1 + $0x240] sm:$0xff]  ;;  %v119_v7 = vld [vmem:[%s1443_s1 + $0x248] sm:$0xff] }
  0x29   :  { %918 = vmatpush3.bf16.msra.mxu0 %v917_v54  ;;  %v925_v4 = vpack.c.bf16 %v117_v1, %v116_v0  ;;  %v136_v8 = vld [vmem:[%s1443_s1 + $0x2d0] sm:$0xff]  ;;  %v137_v9 = vld [vmem:[%s1443_s1 + $0x2d8] sm:$0xff]  ;;  %v929_v10 = vpack.c.bf16 %v119_v7, %v118_v6  ;;  %v138_v14 = vld [vmem:[%s1443_s1 + $0x2e0] sm:$0xff] }
  0x2a   :  { %920 = vmatprep.subr.bf16.mxu0 %v919_v55  ;;  %827 = vmatmul.mubr.msk.f32.vlgmr.msra.gmra.mrb[2].mxu1 %vm151_vm1, %v45_v61  ;;  %v931_v11 = vpack.c.bf16 %v137_v9, %v136_v8  ;;  %v120_v12 = vld [vmem:[%s1443_s1 + $0x250] sm:$0xff]  ;;  %v121_v13 = vld [vmem:[%s1443_s1 + $0x258] sm:$0xff]  ;;  %v139_v15 = vld [vmem:[%s1443_s1 + $0x2e8] sm:$0xff] }
  0x2b   :  { %837 = vmatprep.mubr.msk.f32.mxu1 %vm996_vm0, %v997_v60  ;;  %v933_v16 = vpack.c.bf16 %v121_v13, %v120_v12  ;;  %v935_v17 = vpack.c.bf16 %v139_v15, %v138_v14  ;;  %v122_v18 = vld [vmem:[%s1443_s1 + $0x260] sm:$0xff]  ;;  %v123_v19 = vld [vmem:[%s1443_s1 + $0x268] sm:$0xff]  ;;  %v140_v20 = vld [vmem:[%s1443_s1 + $0x2f0] sm:$0xff] }
  0x2c   :  { %v141_v21 = vld [vmem:[%s1443_s1 + $0x2f8] sm:$0xff]  ;;  %v937_v22 = vpack.c.bf16 %v123_v19, %v122_v18  ;;  %v124_v24 = vld [vmem:[%s1443_s1 + $0x270] sm:$0xff]  ;;  %v43_v27 = vld [vmem:[%s1442_s0 + $0x20] sm:$0xff] }
  0x2d   :  { %922 = vmatpush3.bf16.msra.mxu0 %v921_v62  ;;  %v939_v23 = vpack.c.bf16 %v141_v21, %v140_v20  ;;  %v125_v25 = vld [vmem:[%s1443_s1 + $0x278] sm:$0xff]  ;;  %v694_v29 = vld [vmem:[%s1444_s2] ss:$0 sm:$0xff]  ;;  %v475_v48 = vld [vmem:[%s1447_s5 + $0x8] sm:$0xff] }
  0x2e   :  { %924 = vmatprep.subr.bf16.mxu0 %v923_v63  ;;  %v941_v26 = vpack.c.bf16 %v125_v25, %v124_v24  ;;  %v474_v47 = vld [vmem:[%s1447_s5] sm:$0xff]  ;;  %v476_v49 = vld [vmem:[%s1447_s5 + $0x10] sm:$0xff]  ;;  %v477_v52 = vld [vmem:[%s1447_s5 + $0x18] sm:$0xff] }
  0x2f   :  { %v947_v51 = vpack.c.bf16 %v475_v48, %v474_v47  ;;  %v950_v53 = vpack.c.bf16 %v477_v52, %v476_v49  ;;  %v696_v0 = vld [vmem:[%s1445_s3] ss:$0 sm:$0xff] }
  0x30   :  { %v697_v2 = vld [vmem:[%s1446_s4] ss:$0 sm:$0xff] }
  0x31   :  { %926 = vmatpush3.bf16.msra.mxu0 %v925_v4  ;;  %948 = vmatpush3.bf16.msra.mxu1 %v947_v51  ;;  %v699_v8 = vld [vmem:[%s1448_s6] ss:$0 sm:$0xff] }
  0x32   :  { %928 = vmatprep.subr.bf16.mxu0 %v927_v5  ;;  %949 = vmatprep.subr.bf16.mxu1 %v995_v50  ;;  %v596_v15 = vld [vmem:[%s1451_s9] sm:$0xff] }
  0x35   :  { %930 = vmatpush3.bf16.msra.mxu0 %v929_v10  ;;  %951 = vmatpush3.bf16.msra.mxu1 %v950_v53 }
  0x36   :  { %932 = vmatprep.subr.bf16.mxu0 %v931_v11  ;;  %952 = vmatprep.subr.bf16.mxu1 %v995_v50 }
  0x39   :  { %934 = vmatpush3.bf16.msra.mxu0 %v933_v16 }
  0x3a   :  { %936 = vmatprep.subr.bf16.mxu0 %v935_v17 }
  0x3d   :  { %938 = vmatpush3.bf16.msra.mxu0 %v937_v22 }
  0x3e   :  { %940 = vmatprep.subr.bf16.mxu0 %v939_v23 }
  0x41   :  { %942 = vmatpush3.bf16.msra.mxu0 %v941_v26  ;;  %v701_v26 = vld [vmem:[%s1449_s7] ss:$0 sm:$0xff]  ;;  %s998_s7 = smov [#allocation2]  }
  0x42   :  { %s686_s17 = sshll.u32 %s998_s7, 4  ;;  %s687_s17 = int_to_ptr.vmem [resolvable:$true] %s686_s17 }
  0x43   :  { %p976_p1 = scmp.lt.s32.totalorder %s687_s17, %s687_s17 }
  0x44   :  { %360 = vmatmul.mubr.f32.vlgmr.msra.gmra.mrb[2].mxu0 %v43_v27 }
  0xf7   :  { %v738_v28 = vpop.f32.mrb[0].mxu0 }
  0xf8   :  { %v739_v30 = vpop.f32.mrb[1].mxu0 }
  0xf9   :  { %v773_v31 = vpop.f32.mrb[0].mxu1  ;;  %v740_v32 = vadd.f32 %v739_v30, %v738_v28  ;;  %v702_v28 = vld [vmem:[%s1450_s8] ss:$0 sm:$0xff]  ;;  %s971_s8 = scalar_lea.vmem %s687_s17, 128 }
  0xfa   :  { %v774_v33 = vpop.f32.mrb[1].mxu1  ;;  %p972_p0 = scmp.ne.s32.totalorder %s687_s17, %s971_s8  ;;  %p977_p2 = scmp.lt.s32.totalorder %s971_s8, %s971_s8 }
  0xfb   :  { %v775_v34 = vadd.f32 %v774_v33, %v773_v31  ;;  %v222_v35 = vadd.f32 %v740_v32, %v694_v29 }
  0xfc   :  { %p978_p3 = por %p977_p2, %p976_p1 }
  0xfd   :  { %v292_v36 = vadd.f32 %v775_v34, %v222_v35  ;;  %v431_v37 = vpop.f32.mrb[2].mxu1  ;;  %v704_v35 = vld [vmem:[%s1452_s10] ss:$0 sm:$0xff] }
  0xfe   :  { %v828_v38 = vpop.f32.mrb[3].mxu1  ;;  %p979_p4 = pnand %p978_p3, %p972_p0 }
 0x117   :  { %v808_v39 = vpop.f32.mrb[2].mxu0 }
 0x118   :  { %v809_v40 = vpop.f32.mrb[3].mxu0 }
 0x119   :  { %v810_v41 = vadd.f32 %v809_v40, %v808_v39 }
 0x11b   :  { %v362_v42 = vadd.f32 %v810_v41, %v292_v36 }
 0x11d   :  { %v432_v43 = vadd.f32 %v431_v37, %v362_v42 }
 0x11f   :  { %v438_v44 = vsel %vm437_vm2, %v432_v43, 0.0  ;;  %v443_v45 = vmul.f32 %v432_v43, %v432_v43 }
 0x120   :  { %439 = vadd.xlane.f32.xlu0 %v438_v44 }
 0x121   :  { %v444_v46 = vsel %vm437_vm2, %v443_v45, 0.0 }
 0x124   :  { %445 = vadd.xlane.f32.xlu0 %v444_v46 }
 0x1ad   :  { %v440_v54 = vpop.xlane.xlu0 %439 }
 0x1ae   :  { %v442_v55 = vmul.f32 0.03125, %v440_v54 }
 0x1b0   :  { %v448_v57 = vmul.f32 %v442_v55, %v442_v55  ;;  %v450_v62 = vsub.f32 %v432_v43, %v442_v55 }
 0x1b1   :  { %v446_v56 = vpop.xlane.xlu0 %445 }
 0x1b2   :  { %v447_v58 = vmul.f32 0.03125, %v446_v56 }
 0x1b4   :  { %v449_v59 = vsub.f32 %v447_v58, %v448_v57 }
 0x1b6   :  { %v451_v61 = vadd.f32 1e-05, %v449_v59 }
 0x1b8   :  { %959 = vrsqrt.f32 %v451_v61 }
 0x1c2   :  { %v960_v63 = vpop.eup %959 }
 0x1c3   :  { %v453_v1 = vmul.f32 %v960_v63, %v450_v62 }
 0x1c5   :  { %v460_v50 = vmul.f32 %v696_v0, %v453_v1 }
 0x1c7   :  { %v467_v3 = vadd.f32 %v697_v2, %v460_v50 }
 0x1c9   :  { %v698_v4 = vmul.f32 -1.442695, %v467_v3 }
 0x1cb   :  { %961 = vpow2.f32 %v698_v4 }
 0x1d5   :  { %v962_v5 = vpop.eup %961 }
 0x1d6   :  { %v471_v6 = vadd.f32 1.0, %v962_v5 }
 0x1d8   :  { %963 = vrcp.f32 %v471_v6 }
 0x1e2   :  { %v964_v7 = vpop.eup %963 }
 0x1e3   :  { %838 = vmatmul.mubr.msk.f32.vlgmr.msra.gmra.mrb[4].mxu1 %vm437_vm2, %v964_v7 }
 0x1e4   :  { %844 = vmatprep.mubr.msk.f32.mxu1 %vm996_vm0, %v997_v60  ;;  %v597_v60 = vld [vmem:[%s1451_s9 + $0x8] sm:$0xff] }
 0x1e5   :  { %v953_v16 = vpack.c.bf16 %v597_v60, %v596_v15 }
 0x1e7   :  { %954 = vmatpush3.bf16.msra.mxu1 %v953_v16 }
 0x2b6   :  { %v554_v9 = vpop.f32.mrb[4].mxu1 }
 0x2b7   :  { %v555_v10 = vadd.f32 %v699_v8, %v554_v9  ;;  %v839_v11 = vpop.f32.mrb[5].mxu1 }
 0x2b9   :  { %v560_v12 = vsel %vm151_vm1, %v555_v10, 0.0  ;;  %v565_v13 = vmul.f32 %v555_v10, %v555_v10 }
 0x2ba   :  { %561 = vadd.xlane.f32.xlu1 %v560_v12 }
 0x2bb   :  { %v566_v14 = vsel %vm151_vm1, %v565_v13, 0.0 }
 0x2be   :  { %567 = vadd.xlane.f32.xlu1 %v566_v14 }
 0x347   :  { %v562_v17 = vpop.xlane.xlu1 %561 }
 0x348   :  { %v564_v18 = vmul.f32 0.0625, %v562_v17 }
 0x34a   :  { %v570_v20 = vmul.f32 %v564_v18, %v564_v18  ;;  %v572_v24 = vsub.f32 %v555_v10, %v564_v18 }
 0x34b   :  { %v568_v19 = vpop.xlane.xlu1 %567 }
 0x34c   :  { %v569_v21 = vmul.f32 0.0625, %v568_v19 }
 0x34e   :  { %v571_v22 = vsub.f32 %v569_v21, %v570_v20 }
 0x350   :  { %v573_v23 = vadd.f32 1e-05, %v571_v22 }
 0x352   :  { %965 = vrsqrt.f32 %v573_v23 }
 0x35c   :  { %v966_v25 = vpop.eup %965 }
 0x35d   :  { %v575_v27 = vmul.f32 %v966_v25, %v572_v24 }
 0x35f   :  { %v582_v29 = vmul.f32 %v701_v26, %v575_v27 }
 0x361   :  { %v589_v30 = vadd.f32 %v702_v28, %v582_v29 }
 0x363   :  { %v703_v31 = vmul.f32 -1.442695, %v589_v30 }
 0x365   :  { %967 = vpow2.f32 %v703_v31 }
 0x36f   :  { %v968_v32 = vpop.eup %967 }
 0x370   :  { %v593_v33 = vadd.f32 1.0, %v968_v32 }
 0x372   :  { %969 = vrcp.f32 %v593_v33 }
 0x37c   :  { %v970_v34 = vpop.eup %969 }
 0x37d   :  { %845 = vmatmul.mubr.msk.f32.vlgmr.msra.gmra.mrb[6].mxu1 %vm151_vm1, %v970_v34 }
 0x450   :  { %v674_v36 = vpop.f32.mrb[6].mxu1 }
 0x451   :  { %v675_v37 = vadd.f32 %v704_v35, %v674_v36  ;;  %v846_v38 = vpop.f32.mrb[7].mxu1 }
 0x453   :  { %679 = vst.msk [vmem:[#allocation2] sm:$0xff] %vm678_vm3, %v675_v37 }
 0x454   :  { %982 = shalt.err (!%p979_p4)
}
 0x455   :  { %s983_s0 = scalar_lea.hbm %s1453_s11, 128 }
 0x456   :  { %p984_p5 = scmp.ne.s32.totalorder %s1453_s11, %s983_s0  ;;  %p987_p6 = scmp.lt.u32.totalorder %s983_s0, %s1453_s11 }
 0x458   :  { %p989_p7 = pnand %p987_p6, %p984_p5 }
 0x45a   :  { %992 = shalt.err (!%p989_p7)
}
 0x45b   :  { %689 = dma.vmem_to_hbm [thread:$0]  %s687_s17, 128, %s1453_s11, [#allocation3]  }
 0x45c   :  { %993 = dma.done.wait [#allocation3], 128  }
 0x45d   :  { %994 = vsyncadd [#allocation3], 4294967168 }
 0x45e   :  { %693 = vsyncpa [#allocation3], 1 }

</bundles_post_ra>
